<compile_context>
chip_gen: v7x
topology: tpu7x:2x2x1
jax: 0.10.0
libtpu: 0.0.40
codegen_flags: <defaults>
</compile_context>

<pallas_src>
import functools

import jax
import jax.numpy as jnp
from jax.experimental import pallas as pl
from jax.experimental.pallas import tpu as pltpu

HALO_ROWS = 8        # halo rows stored per side (sublane-aligned DMA block)
_LANE = 128


def _round_up(x, m):
    return ((x + m - 1) // m) * m


def _conv1d_kernel(x_ref, halo_ref, w_ref, b_ref, o_ref, *, K, pad, fuse_taps):
    # x_ref:    (tile_T, Cin)            current time tile, channels last
    # halo_ref: (2*HALO_ROWS, Cin)       rows [0,pad): before-halo, [HALO_ROWS, HALO_ROWS+pad): after-halo
    # w_ref:    (K*Cin, Cout_p) bf16     im2col weights, tap-major
    # b_ref:    (1, Cout_p) f32
    # o_ref:    (tile_T, Cout_p)
    tile_t, cin = x_ref.shape
    cout = o_ref.shape[-1]

    x = x_ref[...]
    halo = halo_ref[...]
    row_ids = jax.lax.broadcasted_iota(jnp.int32, (tile_t, cin), 0)

    # Per-step extension buffers: before-halo rows at the top of `before_ext`,
    # after-halo rows at the bottom of `after_ext`; the rest is don't-care.
    # Built once per grid step, re-aligned per tap with a cheap XLU roll.
    fill = jnp.zeros((tile_t - HALO_ROWS, cin), x.dtype)
    before_ext = jnp.concatenate([halo[:HALO_ROWS], fill], axis=0)
    after_ext = jnp.concatenate([fill, halo[HALO_ROWS:]], axis=0)

    def make_tap(k):
        # Tap k needs rows x[t + k - pad] = x[t - s] with s = pad - k.
        s = pad - k
        if s == 0:
            return x
        xs = pltpu.roll(x, shift=s % tile_t, axis=0)
        if s > 0:
            # Top s rows wrapped around -> take them from the before-halo.
            shift = (-k) % tile_t
            fix = pltpu.roll(before_ext, shift=shift, axis=0) if shift else before_ext
            return jnp.where(row_ids < s, fix, xs)
        # Bottom (-s) rows wrapped around -> take them from the after-halo.
        u = -s
        shift = (HALO_ROWS - u) % tile_t
        fix = pltpu.roll(after_ext, shift=shift, axis=0) if shift else after_ext
        return jnp.where(row_ids >= tile_t - u, fix, xs)

    if fuse_taps:
        # One lane-dense (tile_T, K*Cin) @ (K*Cin, Cout_p) bf16 MXU matmul.
        cols = jnp.concatenate(
            [make_tap(k).astype(jnp.bfloat16) for k in range(K)], axis=-1)
        acc = jnp.dot(cols, w_ref[...], preferred_element_type=jnp.float32)
    else:
        # v5e path: MXU contraction depth is 128, so K accumulated Cin-deep
        # matmuls are already native and skip the lane-axis concat.
        acc = jnp.zeros((tile_t, cout), jnp.float32)
        for k in range(K):
            acc = acc + jnp.dot(make_tap(k).astype(jnp.bfloat16),
                                w_ref[k * cin:(k + 1) * cin, :],
                                preferred_element_type=jnp.float32)

    acc = acc + b_ref[...].astype(jnp.float32)
    o_ref[...] = acc.astype(o_ref.dtype)


def _tpu_vmem_capacity():
    try:
        return int(pltpu.get_tpu_info().vmem_capacity_bytes)
    except Exception:
        return 64 * 1024 * 1024          # conservative (v7x-sized) default


def _prefer_per_tap_matmul():
    try:
        kind = jax.devices()[0].device_kind.lower()
    except Exception:
        return False
    return ("v5e" in kind) or ("v5 lite" in kind) or ("v5lite" in kind)


def _working_set(Cin, Cout_p, K, itemsize):
    per_row = (itemsize * (2 * Cin + 2 * Cout_p)    # double-buffered in/out DMA tiles
               + 2 * K * Cin                         # bf16 im2col columns
               + 4 * Cout_p                          # f32 accumulator
               + 4 * 3 * Cin)                        # ext buffers / rolled temporaries
    fixed = (2 * 2 * K * Cin * Cout_p                # bf16 weights (double-buffered)
             + 2 * 4 * Cout_p                        # bias
             + itemsize * 2 * 2 * HALO_ROWS * Cin)   # halo blocks (double-buffered)
    return per_row, fixed


def _pick_tile_t(T, B, Cin, Cout_p, K, itemsize, budget):
    per_row, fixed = _working_set(Cin, Cout_p, K, itemsize)
    cap = max(16, (budget - fixed) // max(per_row, 1))
    cap = min(cap, 1024, _round_up(T, 16))
    cap -= cap % 16
    cap = max(cap, 16)
    if B == 1 and T > 16:
        # Give both v7x TensorCores work when there is only one batch row.
        half = _round_up(T, 16) // 2
        half -= half % 16
        cap = min(cap, max(16, half))
    # Prefer a divisor of T (no time padding) when a reasonably large one exists.
    best = None
    for cand in range(cap, 15, -16):
        if T % cand == 0:
            best = cand
            break
    if best is not None and best * 4 >= cap:
        return best
    return cap


def transpose_conv1d(x, w, b, *, tile_t=None):
    """Equivalent of Transpose(nn.Conv1d(Cin, Cout, K, padding=K//2)).forward(x).

    x: (B, T, Cin) float32
    w: (Cout, Cin, K) float32  (PyTorch Conv1d layout), K odd
    b: (Cout,) float32
    returns (B, T, Cout) in x.dtype
    """
    B, T, Cin = x.shape
    Cout, Cin_w, K = w.shape
    assert Cin_w == Cin, "weight Cin mismatch"
    # TODO(synk): even kernel sizes / K == 1 change PyTorch's 'same'-padding
    # arithmetic and are not handled here.
    assert K % 2 == 1 and K >= 3, "only odd kernel sizes >= 3 are supported"
    pad = K // 2
    assert pad <= HALO_ROWS, "kernel sizes beyond 2*HALO_ROWS+1 unsupported"

    itemsize = x.dtype.itemsize
    Cout_p = _round_up(Cout, _LANE)          # lane-dense output stores

    vmem_cap = _tpu_vmem_capacity()
    budget = min(max(vmem_cap * 3 // 8, 8 * 1024 * 1024), 48 * 1024 * 1024)

    if tile_t is None or tile_t < 16 or tile_t % 8 != 0:
        tile_t = _pick_tile_t(T, B, Cin, Cout_p, K, itemsize, budget)
    n_t = pl.cdiv(T, tile_t)
    Tp = n_t * tile_t

    # Pad the time axis up to a tile multiple; the ragged tail rows are zeros
    # (== the 'same' conv padding) and are sliced off below.
    xp = x if Tp == T else jnp.pad(x, ((0, 0), (0, Tp - T), (0, 0)))

    # Halo side input: for every tile, the pad rows just before / after it
    # (zeros at the sequence ends), stored in an 8-row-aligned (16, Cin) block.
    xt = xp.reshape(B, n_t, tile_t, Cin)
    zrows = jnp.zeros((B, 1, pad, Cin), x.dtype)
    before = jnp.concatenate([zrows, xt[:, :-1, tile_t - pad:, :]], axis=1)
    after = jnp.concatenate([xt[:, 1:, :pad, :], zrows], axis=1)
    before = jnp.pad(before, ((0, 0), (0, 0), (0, HALO_ROWS - pad), (0, 0)))
    after = jnp.pad(after, ((0, 0), (0, 0), (0, HALO_ROWS - pad), (0, 0)))
    halo = jnp.concatenate([before, after], axis=2)     # (B, n_t, 16, Cin)

    # im2col weights, tap-major, bf16 MXU operands, lane-padded output channels.
    w_im2col = jnp.transpose(w, (2, 1, 0)).reshape(K * Cin, Cout)
    w_im2col = jnp.pad(w_im2col, ((0, 0), (0, Cout_p - Cout))).astype(jnp.bfloat16)
    b2d = jnp.pad(b, (0, Cout_p - Cout)).astype(jnp.float32).reshape(1, Cout_p)

    per_row, fixed = _working_set(Cin, Cout_p, K, itemsize)
    work = fixed + per_row * tile_t
    vmem_limit = int(min(vmem_cap * 7 // 8, max(2 * work, 32 * 1024 * 1024)))

    kernel = functools.partial(_conv1d_kernel, K=K, pad=pad,
                               fuse_taps=not _prefer_per_tap_matmul())

    out = pl.pallas_call(
        kernel,
        out_shape=jax.ShapeDtypeStruct((B, Tp, Cout_p), x.dtype),
        grid_spec=pltpu.PrefetchScalarGridSpec(
            num_scalar_prefetch=0,
            grid=(B, n_t),
            in_specs=[
                pl.BlockSpec((pl.Squeezed(), tile_t, Cin),
                             lambda bi, ti: (bi, ti, 0)),
                pl.BlockSpec((pl.Squeezed(), pl.Squeezed(), 2 * HALO_ROWS, Cin),
                             lambda bi, ti: (bi, ti, 0, 0)),
                pl.BlockSpec((K * Cin, Cout_p), lambda bi, ti: (0, 0)),
                pl.BlockSpec((1, Cout_p), lambda bi, ti: (0, 0)),
            ],
            out_specs=pl.BlockSpec((pl.Squeezed(), tile_t, Cout_p),
                                   lambda bi, ti: (bi, ti, 0)),
        ),
        compiler_params=pltpu.CompilerParams(
            dimension_semantics=("parallel", "parallel"),
            vmem_limit_bytes=vmem_limit,
        ),
    )(xp, halo, w_im2col, b2d)

    if Tp != T or Cout_p != Cout:
        out = out[:, :T, :Cout]
    return out


def _reference(x, w, b):
    # Pure-JAX reference mimicking the PyTorch module exactly:
    # x.transpose(1,2) -> Conv1d("same") -> transpose(1,2)
    x_nct = jnp.transpose(x, (0, 2, 1))                 # (B, Cin, T)
    y = jax.lax.conv_general_dilated(
        x_nct, w, window_strides=(1,), padding="SAME",
        dimension_numbers=("NCH", "OIH", "NCH"),
        precision=jax.lax.Precision.HIGHEST)
    y = y + b[None, :, None]
    return jnp.transpose(y, (0, 2, 1))                  # (B, T, Cout)


if __name__ == "__main__":
    B, T, C, K = 2, 256, 128, 3                         # lane-dense channels

    key = jax.random.PRNGKey(0)
    kx, kw, kb = jax.random.split(key, 3)
    x = jax.random.normal(kx, (B, T, C), dtype=jnp.float32)
    w = jax.random.normal(kw, (C, C, K), dtype=jnp.float32) * 0.1
    b = jax.random.normal(kb, (C,), dtype=jnp.float32) * 0.1

    # bf16 MXU operands (f32 accumulate) -> ~1e-2-level deviation from the
    # f32-HIGHEST reference; tolerances loosened accordingly.
    ATOL, RTOL = 1e-1, 5e-2

    y_ref = _reference(x, w, b)

    # 1) explicit small tile -> exercises cross-tile halo handling (grid (2,4))
    y1 = transpose_conv1d(x, w, b, tile_t=64)
    jax.block_until_ready(y1)
    assert y1.shape == (B, T, C)
    assert jnp.allclose(y1, y_ref, atol=ATOL, rtol=RTOL)

    # 2) auto-tiled path (tile size from the VMEM-capacity-derived budget)
    y2 = transpose_conv1d(x, w, b)
    jax.block_until_ready(y2)
    assert jnp.allclose(y2, y_ref, atol=ATOL, rtol=RTOL)

    # 3) ragged T (not a tile multiple) -> padded-time path
    T2 = 200
    x2 = x[:, :T2, :]
    y3 = transpose_conv1d(x2, w, b)
    jax.block_until_ready(y3)
    assert y3.shape == (B, T2, C)
    assert jnp.allclose(y3, _reference(x2, w, b), atol=ATOL, rtol=RTOL)

    # 4) K=5 -> multi-row halo fix-ups (pad=2) through the single-select path
    w5 = jax.random.normal(kw, (C, C, 5), dtype=jnp.float32) * 0.1
    y5 = transpose_conv1d(x, w5, b, tile_t=64)
    jax.block_until_ready(y5)
    assert jnp.allclose(y5, _reference(x, w5, b), atol=ATOL, rtol=RTOL)

    print("KERNEL_OK")
</pallas_src>

<mosaic_0001>
module attributes {stable_mosaic.version = 11 : i64} {
  func.func @_conv1d_kernel(%arg0: i32, %arg1: i32, %arg2: memref<1x64x128xf32, #tpu.memory_space<vmem>>, %arg3: memref<1x1x16x128xf32, #tpu.memory_space<vmem>>, %arg4: memref<384x128xbf16, #tpu.memory_space<vmem>>, %arg5: memref<1x128xf32, #tpu.memory_space<vmem>>, %arg6: memref<1x64x128xf32, #tpu.memory_space<vmem>>) attributes {dimension_semantics = [#tpu.dimension_semantics<parallel>, #tpu.dimension_semantics<parallel>], iteration_bounds = array<i64: 2, 4>, scalar_prefetch = 0 : i64, scratch_operands = 0 : i64, tpu.core_type = #tpu.core_type<tc>, window_params = [{transform_indices = @transform_0, window_bounds = array<i64: 1, 64, 128>}, {transform_indices = @transform_1, window_bounds = array<i64: 1, 1, 16, 128>}, {pipeline_mode = #tpu.pipeline_mode<synchronous>, transform_indices = @transform_2, window_bounds = array<i64: 384, 128>}, {pipeline_mode = #tpu.pipeline_mode<synchronous>, transform_indices = @transform_3, window_bounds = array<i64: 1, 128>}, {transform_indices = @transform_4, window_bounds = array<i64: 1, 64, 128>}]} {
    %c0 = arith.constant 0 : index
    %c0_0 = arith.constant 0 : index
    %c0_1 = arith.constant 0 : index
    %0 = vector.load %arg2[%c0, %c0_0, %c0_1] : memref<1x64x128xf32, #tpu.memory_space<vmem>>, vector<1x64x128xf32>
    %1 = vector.shape_cast %0 : vector<1x64x128xf32> to vector<64x128xf32>
    %c0_2 = arith.constant 0 : index
    %c0_3 = arith.constant 0 : index
    %c0_4 = arith.constant 0 : index
    %c0_5 = arith.constant 0 : index
    %2 = vector.load %arg3[%c0_2, %c0_3, %c0_4, %c0_5] : memref<1x1x16x128xf32, #tpu.memory_space<vmem>>, vector<1x1x16x128xf32>
    %3 = vector.shape_cast %2 : vector<1x1x16x128xf32> to vector<16x128xf32>
    %4 = tpu.iota {dimensions = array<i32: 0>} : vector<64x128xi32>
    %cst = arith.constant 0.000000e+00 : f32
    %5 = vector.broadcast %cst : f32 to vector<56x128xf32>
    %6 = vector.extract_strided_slice %3 {offsets = [0, 0], sizes = [8, 128], strides = [1, 1]} : vector<16x128xf32> to vector<8x128xf32>
    %7 = tpu.concatenate %6, %5 in 0 : vector<8x128xf32>, vector<56x128xf32> -> vector<64x128xf32>
    %8 = vector.extract_strided_slice %3 {offsets = [8, 0], sizes = [8, 128], strides = [1, 1]} : vector<16x128xf32> to vector<8x128xf32>
    %9 = tpu.concatenate %5, %8 in 0 : vector<56x128xf32>, vector<8x128xf32> -> vector<64x128xf32>
    %c1_i32 = arith.constant 1 : i32
    %10 = tpu.dynamic_rotate %1 by %c1_i32 dim 0 : vector<64x128xf32>, i32 -> vector<64x128xf32>
    %c1_i32_6 = arith.constant 1 : i32
    %11 = vector.broadcast %c1_i32_6 : i32 to vector<64x128xi32>
    %12 = arith.cmpi slt, %4, %11 : vector<64x128xi32>
    %13 = arith.select %12, %7, %10 : vector<64x128xi1>, vector<64x128xf32>
    %14 = arith.truncf %13 : vector<64x128xf32> to vector<64x128xbf16>
    %15 = arith.truncf %1 : vector<64x128xf32> to vector<64x128xbf16>
    %c63_i32 = arith.constant 63 : i32
    %16 = tpu.dynamic_rotate %1 by %c63_i32 dim 0 : vector<64x128xf32>, i32 -> vector<64x128xf32>
    %c7_i32 = arith.constant 7 : i32
    %17 = tpu.dynamic_rotate %9 by %c7_i32 dim 0 : vector<64x128xf32>, i32 -> vector<64x128xf32>
    %c63_i32_7 = arith.constant 63 : i32
    %18 = vector.broadcast %c63_i32_7 : i32 to vector<64x128xi32>
    %19 = arith.cmpi sge, %4, %18 : vector<64x128xi32>
    %20 = arith.select %19, %17, %16 : vector<64x128xi1>, vector<64x128xf32>
    %21 = arith.truncf %20 : vector<64x128xf32> to vector<64x128xbf16>
    %22 = tpu.concatenate %14, %15, %21 in 1 : vector<64x128xbf16>, vector<64x128xbf16>, vector<64x128xbf16> -> vector<64x384xbf16>
    %c0_8 = arith.constant 0 : index
    %c0_9 = arith.constant 0 : index
    %23 = vector.load %arg4[%c0_8, %c0_9] : memref<384x128xbf16, #tpu.memory_space<vmem>>, vector<384x128xbf16>
    %cst_10 = arith.constant dense<0.000000e+00> : vector<64x128xf32>
    %24 = tpu.matmul %22, %23, %cst_10 {dimension_numbers = #tpu.dot_dimension_numbers<[1], [0], [0], [1], [0, 0, 1, 1], [], []>} : vector<64x384xbf16>, vector<384x128xbf16>, vector<64x128xf32> -> vector<64x128xf32>
    %c0_11 = arith.constant 0 : index
    %c0_12 = arith.constant 0 : index
    %25 = vector.load %arg5[%c0_11, %c0_12] : memref<1x128xf32, #tpu.memory_space<vmem>>, vector<1x128xf32>
    %26 = vector.broadcast %25 : vector<1x128xf32> to vector<64x128xf32>
    %27 = arith.addf %24, %26 : vector<64x128xf32>
    %c0_13 = arith.constant 0 : index
    %c0_14 = arith.constant 0 : index
    %c0_15 = arith.constant 0 : index
    %28 = vector.load %arg6[%c0_13, %c0_14, %c0_15] : memref<1x64x128xf32, #tpu.memory_space<vmem>>, vector<1x64x128xf32>
    %29 = vector.shape_cast %28 : vector<1x64x128xf32> to vector<64x128xf32>
    %30 = vector.shape_cast %27 : vector<64x128xf32> to vector<1x64x128xf32>
    tpu.vector_store %arg6[%c0_13, %c0_14, %c0_15], %30 {strides = array<i32>} : memref<1x64x128xf32, #tpu.memory_space<vmem>>, vector<1x64x128xf32>,
    return
  }
  func.func @transform_0(%arg0: i32, %arg1: i32) -> (i32, i32, i32) {
    %c0_i32 = arith.constant 0 : i32
    %c0_i32_0 = arith.constant 0 : i32
    return %arg0, %arg1, %c0_i32 : i32, i32, i32
  }
  func.func @transform_1(%arg0: i32, %arg1: i32) -> (i32, i32, i32, i32) {
    %c0_i32 = arith.constant 0 : i32
    %c0_i32_0 = arith.constant 0 : i32
    %c0_i32_1 = arith.constant 0 : i32
    return %arg0, %arg1, %c0_i32, %c0_i32_0 : i32, i32, i32, i32
  }
  func.func @transform_2(%arg0: i32, %arg1: i32) -> (i32, i32) {
    %c0_i32 = arith.constant 0 : i32
    %c0_i32_0 = arith.constant 0 : i32
    %c0_i32_1 = arith.constant 0 : i32
    return %c0_i32, %c0_i32_0 : i32, i32
  }
  func.func @transform_3(%arg0: i32, %arg1: i32) -> (i32, i32) {
    %c0_i32 = arith.constant 0 : i32
    %c0_i32_0 = arith.constant 0 : i32
    %c0_i32_1 = arith.constant 0 : i32
    return %c0_i32, %c0_i32_0 : i32, i32
  }
  func.func @transform_4(%arg0: i32, %arg1: i32) -> (i32, i32, i32) {
    %c0_i32 = arith.constant 0 : i32
    %c0_i32_0 = arith.constant 0 : i32
    return %arg0, %arg1, %c0_i32 : i32, i32, i32
  }
}

</mosaic_0001>

<bundles_post_ra>
// kernel: tpu_custom_call.1
= control target key start
LH: loop header
LB: loop body
LE: loop exit
PB: predicated region body
PF: predicated region fallthrough
CT: control target
= control target key end

     0   :  { %s1730_s0 = inlined_call_operand.hbm [shape: f32[2,256,128], index: 0, kind: input, shape index: {}]   ;;  %s1731_s1 = inlined_call_operand.hbm [shape: f32[2,4,16,128], index: 1, kind: input, shape index: {}]   ;;  %s1732_s2 = inlined_call_operand.hbm [shape: bf16[384,128], index: 2, kind: input, shape index: {}]   ;;  %s1733_s3 = inlined_call_operand.vmem [shape: f32[1,128], index: 3, kind: input, shape index: {}]   ;;  %s1734_s4 = inlined_call_operand.hbm [shape: f32[2,256,128], index: 4, kind: output, shape index: {}]  }
   0x1   :  { %1743 = sst [smem:[#allocation18_spill]] %s1730_s0 }
   0x2   :  { %1744 = sst [smem:[#allocation19_spill]] %s1732_s2 }
   0x3   :  { %1745 = sst [smem:[#allocation20_spill]] %s1734_s4 }
   0x4   :  { %9 = vsyncpa [#allocation3], 0 }
   0x5   :  { %11 = vsyncpa [#allocation3 + $0x1], 0 }
   0x6   :  { %12 = vsyncpa [#allocation6], 0 }
   0x7   :  { %14 = vsyncpa [#allocation6 + $0x1], 0 }
   0x8   :  { %15 = vsyncpa [#allocation4], 0 }
   0x9   :  { %17 = vsyncpa [#allocation4 + $0x1], 0  ;;  %s1352_s15 = smov 0   ;;  %s1354_s16 = smov 0  }
   0xa   :  { %s1356_s17 = smov 0   ;;  %s1358_s18 = smov 0  }
   0xb   :  { %s1360_s19 = smov 0   ;;  %s1362_s20 = smov 0  }
   0xc   :  { %s1364_s21 = smov 0   ;;  %s1366_s22 = smov 0  }
   0xd LB: > { %1746 = sst [smem:[#allocation13_spill]] %s1287_s15  ;;  %s1393_s23 = sadd.s32 4294967295, %s1315_s22   ;;  %s1315_s22 = sphi %s1366_s22, %s23_s22   ;;  %s1311_s21 = sphi %s1364_s21, %s1778_s21   ;;  %s1307_s20 = sphi %s1362_s20, %s1777_s20   ;;  %s1303_s19 = sphi %s1360_s19, %s1776_s19   ;;  %s1299_s18 = sphi %s1358_s18, %s1775_s18   ;;  %s1295_s17 = sphi %s1356_s17, %s1774_s17   ;;  %s1291_s16 = sphi %s1354_s16, %s1773_s16   ;;  %s1287_s15 = sphi %s1352_s15, %s1772_s15  }
   0xe   : > { %s873_s24 = sadd.s32 4294967294, %s1315_s22   ;;  %p57_p0 = scmp.ne.s32.totalorder %s1291_s16, %s1287_s15 }
   0xf   : > { %p1735_p1 = scmp.eq.s32.totalorder %s1393_s23, 0  ;;  %p159_p3 = scmp.eq.s32.totalorder %s873_s24, 7 }
  0x10   : > { %p874_p5 = scmp.ge.s32.totalorder %s1315_s22, 1  ;;  %p166_p7 = scmp.lt.s32.totalorder %s1315_s22, 9 }
  0x11   : > { %p1402_p4 = por %p1735_p1, %p57_p0  ;;  %p1407_p6 = por %p159_p3, %p57_p0 }
  0x12   : > { %p1412_p8 = pnand %p874_p5, %p166_p7  ;;  %s1317_s28 = smov [#allocation7]  }
  0x13   : > { %s1747_s25 = scalar_select %p1402_p4, 1, 0 }
  0x14   : > { %s1748_s26 = scalar_select %p1407_p6, 1, 0 }
  0x15   : > { %s1750_s27 = scalar_select %p1412_p8, 1, 0 }
  0x16   : > { %1749 = sst [smem:[#allocation14_spill]] %s1748_s26  ;;  %s178_s29 = sshll.u32 %s1317_s28, 4  ;;  %s179_s29 = int_to_ptr.vmem [resolvable:$true] %s178_s29 }
  0x17   : > { %p1007_p9 = pneg %p1412_p8  ;;  %s1752_s2 = sld [smem:[#allocation19_spill]] }
  0x19   : > { %p1420_p10 = pnand %p1007_p9, %p1735_p1 }
  0x1b   : > { %p1123_p12 = pneg %p1420_p10 }
  0x1d   : > { %s1121_s7 = scalar_lea.hbm %s1752_s2, 3072 }
  0x1e   : > { %p1122_p11 = scmp.ne.s32.totalorder %s1752_s2, %s1121_s7  ;;  %p1128_p3 = scmp.lt.u32.totalorder %s1121_s7, %s1752_s2 }
  0x20   : > { %p1124_p13 = pnand %p1123_p12, %p1122_p11 }
  0x22   : > { %p1125_p0 = pneg %p1124_p13 }
  0x24   : > { %p1130_p5 = pnand %p1128_p3, %p1125_p0 }
  0x26   : > { %1133 = shalt.err (!%p1130_p5)
}
  0x27   : > { %s1134_s12 = scalar_lea.vmem %s179_s29, 3072  ;;  %p1142_p2 = scmp.lt.s32.totalorder %s179_s29, %s179_s29 }
  0x28   : > { %p1135_p7 = scmp.ne.s32.totalorder %s179_s29, %s1134_s12  ;;  %p1143_p6 = scmp.lt.s32.totalorder %s1134_s12, %s1134_s12 }
  0x2a   : > { %p1137_p9 = pnand %p1135_p7, %p1123_p12  ;;  %p1144_p4 = por %p1143_p6, %p1142_p2 }
  0x2c   : > { %p1138_p1 = pneg %p1137_p9 }
  0x2e   : > { %p1145_p8 = pnand %p1144_p4, %p1138_p1 }
  0x30   : > { %1148 = shalt.err (!%p1145_p8)
}
  0x31   : > { %s1318_s13 = smov 64   ;;  %s1319_s14 = smov 4  }
  0x32   : > { %1010 = dma.hbm_to_vmem [thread:$0]  (!%p1420_p10), %s1752_s2, 3072, %s179_s29, [#allocation6], %s1318_s13, %s1318_s13, %s1319_s14  }
  0x33   : > { %s32_s5 = sadd.s32 1, %s1307_s20  ;;  %s35_s6 = sadd.s32 1, %s1311_s21 }
  0x34   : > { %p33_p1 = scmp.ge.s32.totalorder %s32_s5, 4  ;;  %s44_s7 = sadd.s32 1, %s1295_s17 }
  0x35   : > { %p51_p2 = scmp.ne.s32.totalorder %s1295_s17, %s1291_s16  ;;  %p52_p4 = scmp.eq.s32.totalorder %s1315_s22, 0 }
  0x36   : > { %s1780_s5 = smov (%p33_p1, %s32_s5), 0  ;;  %s1782_s6 = smov (!%p33_p1, %s35_s6), %s1311_s21 }
  0x37   : > { %1753 = sst [smem:[#allocation15_spill]] %s1780_s5  ;;  %s40_s8 = ssub.s32 %s1307_s20, %s1780_s5 }
  0x38   : > { %p37_p6 = scmp.ge.s32.totalorder %s1782_s6, 2  ;;  %p1754_p8 = scmp.eq.s32.totalorder %s1393_s23, 7 }
  0x39   : > { %p1457_p10 = por %p52_p4, %p51_p2  ;;  %p1023_p12 = scmp.lt.s32.totalorder %s1315_s22, 8 }
  0x3a   : > { %p1453_p11 = por %p1754_p8, %p51_p2  ;;  %s1784_s6 = smov (%p37_p6, %s1782_s6), 0 }
  0x3b   : > { %1757 = sst [smem:[#allocation16_spill]] %s1784_s6  ;;  %s1465_s9 = sand.u32 1, %s1295_s17  }
  0x3c   : > { %s878_s10 = sshll.u32 %s1307_s20, 3  ;;  %s39_s11 = ssub.s32 %s1311_s21, %s1784_s6 }
  0x3d   : > { %s41_s12 = sor.u32 %s40_s8, %s39_s11  ;;  %s877_s13 = sshll.u32 %s1465_s9, 6 }
  0x3e   : > { %p42_p13 = scmp.eq.s32.totalorder %s41_s12, 0  ;;  %s879_s14 = sshll.u32 %s1311_s21, 5 }
  0x3f   : > { %s199_s24 = scalar_lea.vmem [#allocation2], %s877_s13  ;;  %s205_s5 = sadd.s32 %s879_s14, %s878_s10 }
  0x40   : > { %s208_s28 = sshll.u32 %s199_s24, 4  ;;  %s880_s26 = sshll.u32 %s205_s5, 7  ;;  %s1475_s28 = int_to_ptr.vmem [resolvable:$true] %s208_s28 }
  0x41   : > { %s1473_s2 = scalar_select %p42_p13, %s1295_s17, %s44_s7  }
  0x42   : > { %p1481_p0 = pnand %p1023_p12, %p1457_p10  ;;  %s1760_s0 = sld [smem:[#allocation18_spill]] }
  0x43   : > { %1758 = sst [smem:[#allocation17_spill]] %s1473_s2  ;;  %s196_s7 = scalar_lea.sflag [#allocation3], %s1465_s9 }
  0x44   : > { %p1151_p5 = pneg %p1481_p0 }
  0x48   : > { %s1488_s8 = scalar_lea.hbm %s1760_s0, %s880_s26  ;;  %s1154_s4 = scalar_lea.hbm %s1760_s0, 8192 }
  0x49   : > { %s1149_s10 = scalar_lea.hbm %s1488_s8, 1024  ;;  %p1155_p1 = scmp.lt.u32.totalorder %s1488_s8, %s1760_s0 }
  0x4a   : > { %p1150_p3 = scmp.ne.s32.totalorder %s1488_s8, %s1149_s10  ;;  %p1156_p2 = scmp.lt.u32.totalorder %s1154_s4, %s1149_s10 }
  0x4b   : > { %p1158_p6 = scmp.lt.u32.totalorder %s1149_s10, %s1488_s8 }
  0x4c   : > { %p1152_p7 = pnand %p1151_p5, %p1150_p3  ;;  %p1157_p4 = por %p1156_p2, %p1155_p1 }
  0x4e   : > { %p1153_p9 = pneg %p1152_p7  ;;  %p1159_p8 = por %p1158_p6, %p1157_p4 }
  0x50   : > { %p1160_p10 = pnand %p1159_p8, %p1153_p9 }
  0x52   : > { %1163 = shalt.err (!%p1160_p10)
}
  0x53   : > { %s1164_s11 = scalar_lea.vmem %s1475_s28, 1024  ;;  %s1320_s12 = smov [#allocation2]  }
  0x54   : > { %p1165_p12 = scmp.ne.s32.totalorder %s1475_s28, %s1164_s11  ;;  %s1169_s13 = sshll.u32 %s1320_s12, 4  ;;  %s1170_s13 = int_to_ptr.vmem [resolvable:$false] %s1169_s13 }
  0x55   : > { %s1171_s14 = scalar_lea.vmem %s1170_s13, 2048  ;;  %p1172_p7 = scmp.lt.s32.totalorder %s1475_s28, %s1170_s13 }
  0x56   : > { %p1167_p13 = pnand %p1165_p12, %p1151_p5  ;;  %p1173_p1 = scmp.lt.s32.totalorder %s1171_s14, %s1164_s11 }
  0x58   : > { %p1168_p3 = pneg %p1167_p13  ;;  %p1174_p2 = por %p1173_p1, %p1172_p7 }
  0x5a   : > { %p1175_p4 = pnand %p1174_p2, %p1168_p3 }
  0x5c   : > { %1178 = shalt.err (!%p1175_p4)
}
  0x5d   : > { %s1321_s24 = smov 128   ;;  %s1322_s10 = smov 8  }
  0x5e   : > { %1014 = dma.hbm_to_vmem [thread:$0]  (!%p1481_p0), %s1488_s8, 1024, %s1475_s28, %s196_s7, %s1321_s24, %s1321_s24, %s1322_s10  }
  0x5f   : > { %s218_s5 = sand.u32 1, %s1315_s22   ;;  %s881_s29 = sshll.u32 %s1465_s9, 4 }
  0x60   : > { %s882_s4 = sshll.u32 %s1307_s20, 1  ;;  %s883_s6 = sshll.u32 %s1311_s21, 3 }
  0x61   : > { %s228_s26 = sadd.s32 %s883_s6, %s882_s4  ;;  %s222_s11 = scalar_lea.vmem [#allocation5], %s881_s29 }
  0x62   : > { %s231_s12 = sshll.u32 %s222_s11, 4  ;;  %s884_s13 = sshll.u32 %s228_s26, 7  ;;  %s1525_s12 = int_to_ptr.vmem [resolvable:$true] %s231_s12 }
  0x63   : > { %s1530_s2 = scalar_lea.hbm %s1731_s1, %s884_s13  ;;  %s1532_s28 = scalar_lea.sflag [#allocation6], %s218_s5 }
  0x64   : > { %s1179_s9 = scalar_lea.hbm %s1530_s2, 256  ;;  %s1184_s29 = scalar_lea.hbm %s1731_s1, 2048 }
  0x65   : > { %p1180_p9 = scmp.ne.s32.totalorder %s1530_s2, %s1179_s9  ;;  %p1185_p10 = scmp.lt.u32.totalorder %s1530_s2, %s1731_s1 }
  0x66   : > { %p1186_p12 = scmp.lt.u32.totalorder %s1184_s29, %s1179_s9  ;;  %p1188_p3 = scmp.lt.u32.totalorder %s1179_s9, %s1530_s2 }
  0x67   : > { %p1182_p6 = pnand %p1180_p9, %p1151_p5 }
  0x68   : > { %p1187_p13 = por %p1186_p12, %p1185_p10 }
  0x69   : > { %p1183_p8 = pneg %p1182_p6 }
  0x6a   : > { %p1189_p7 = por %p1188_p3, %p1187_p13 }
  0x6c   : > { %p1190_p1 = pnand %p1189_p7, %p1183_p8 }
  0x6e   : > { %1193 = shalt.err (!%p1190_p1)
}
  0x6f   : > { %s1194_s5 = scalar_lea.vmem %s1525_s12, 256  ;;  %s1323_s6 = smov [#allocation5]  }
  0x70   : > { %p1195_p2 = scmp.ne.s32.totalorder %s1525_s12, %s1194_s5  ;;  %s1199_s26 = sshll.u32 %s1323_s6, 4  ;;  %s1200_s26 = int_to_ptr.vmem [resolvable:$false] %s1199_s26 }
  0x71   : > { %s1201_s11 = scalar_lea.vmem %s1200_s26, 512  ;;  %p1202_p6 = scmp.lt.s32.totalorder %s1525_s12, %s1200_s26 }
  0x72   : > { %p1197_p4 = pnand %p1195_p2, %p1151_p5  ;;  %p1203_p10 = scmp.lt.s32.totalorder %s1201_s11, %s1194_s5 }
  0x74   : > { %p1198_p9 = pneg %p1197_p4  ;;  %p1204_p12 = por %p1203_p10, %p1202_p6 }
  0x76   : > { %p1205_p13 = pnand %p1204_p12, %p1198_p9 }
  0x78   : > { %1208 = shalt.err (!%p1205_p13)
}
  0x79   : > { %1017 = dma.hbm_to_vmem [thread:$0]  (!%p1481_p0), %s1530_s2, 256, %s1525_s12, %s1532_s28, %s1321_s24, %s1321_s24, %s1322_s10  }
  0x7a   : > { %p1761_p5 = scmp.ne.s32.totalorder %s1750_s27, 0 }
  0x7b   : > { %s1564_s13 = sand.u32 (!%p1761_p5), 1, %s1291_s16   ;;  %p1762_p8 = scmp.ne.s32.totalorder (!%p1761_p5), %s1747_s25, 0 }
  0x7c   : > { %243 = sbr.rel (%p1761_p5) target bundleno = 431 (0x1af), region = 36  ;;  %s886_s14 = sshll.u32 (!%p1761_p5), %s1564_s13, 6 }
  0x7d   : > { %s246_s9 = scalar_lea.sflag (!%p1761_p5), [#allocation3], %s1564_s13  ;;  %s1570_s15 = scalar_lea.vmem (!%p1761_p5), [#allocation2], %s886_s14 }
  0x83   : > { %1270 = dma.done.wait (%p1762_p8), %s246_s9, 1024  }
  0x84   : > { %1272 = vsyncadd (%p1762_p8), %s246_s9, 4294966272  ;;  %s254_s2 = sand.u32 1, %s1393_s23   ;;  %s887_s27 = sshll.u32 %s1564_s13, 4 }
  0x85   : > { %s255_s24 = scalar_lea.sflag [#allocation6], %s254_s2  ;;  %s1578_s10 = scalar_lea.vmem [#allocation5], %s887_s27 }
  0x86   : > { %1274 = dma.done.wait (%p1762_p8), %s255_s24, 256  }
  0x87   : > { %1276 = vsyncadd (%p1762_p8), %s255_s24, 4294967040  ;;  %p1763_p0 = scmp.eq.s32.totalorder %s1393_s23, 0 }
  0x89   : > { %1278 = dma.done.wait (%p1763_p0), [#allocation6], 3072   ;;  %p1764_p3 = pmov %p1763_p0 }
  0x8a   : > { %v1097_v0 = vld [vmem:[#allocation7 + $0x40] sm:$0xff]   ;;  %v1099_v2 = vld [vmem:[#allocation7 + $0x48] sm:$0xff]   ;;  %v1102_v5 = vld [vmem:[#allocation7 + $0x50] sm:$0xff]   ;;  %v305_v15 = vlaneseq  ;;  %s1658_s12 = scalar_lea.vmem [#allocation8], %s886_s14  ;;  %s916_s28 = sshll.u32 %s1299_s18, 3 }
  0x8b   : > { %1280 = vsyncadd (%p1764_p3), [#allocation6], 4294964224  ;;  %v1098_v1 = vld [vmem:[#allocation7] sm:$0xff]   ;;  %921 = vmatprep.subr.bf16.mxu0 %v1097_v0  ;;  %v1101_v4 = vld [vmem:[#allocation7 + $0x8] sm:$0xff]   ;;  %s917_s8 = sshll.u32 %s1303_s19, 5  ;;  %s747_s29 = sshll.u32 %s1658_s12, 4  ;;  %s1669_s29 = int_to_ptr.vmem [resolvable:$true] %s747_s29 }
  0x8c   : > { %922 = vmatpush3.bf16.msra.mxu0 %v1098_v1  ;;  %v1100_v3 = vld [vmem:[#allocation7 + $0x80] sm:$0xff]   ;;  %v1103_v6 = vld [vmem:[#allocation7 + $0x88] sm:$0xff]   ;;  %v1104_v7 = vld [vmem:[#allocation7 + $0x10] sm:$0xff]   ;;  %v1588_v19 = vshrl.u32 %v305_v15, 7  ;;  %s744_s7 = sadd.s32 %s917_s8, %s916_s28  ;;  %s1765_s0 = sld [smem:[#allocation20_spill]] }
  0x8d   : > { %923 = vmatprep.subr.bf16.mxu0 %v1099_v2  ;;  %973 = vmatprep.subr.bf16.mxu1 %v1100_v3  ;;  %v1105_v8 = vld [vmem:[#allocation7 + $0x58] sm:$0xff]   ;;  %v1106_v9 = vld [vmem:[#allocation7 + $0x90] sm:$0xff]   ;;  %v1108_v11 = vld [vmem:[#allocation7 + $0x60] sm:$0xff]   ;;  %s918_s4 = sshll.u32 %s744_s7, 7  ;;  %s732_s6 = scalar_lea.sflag [#allocation4], %s1564_s13 }
  0x8e   : > { %974 = vmatpush3.bf16.msra.mxu1 %v1100_v3  ;;  %v1107_v10 = vld [vmem:[#allocation7 + $0x18] sm:$0xff]   ;;  %v1110_v13 = vld [vmem:[#allocation7 + $0x20] sm:$0xff]   ;;  %v1111_v16 = vld [vmem:[#allocation7 + $0x68] sm:$0xff]   ;;  %vm322_vm0 = vcmp.lt.s32.totalorder %v1588_v19, 1  ;;  %vm362_vm1 = vcmp.lt.s32.totalorder %v1588_v19, 7  ;;  %v313_v51 = vadd.s32 56, %v1588_v19 }
  0x8f   : > { %975 = vmatprep.subr.bf16.mxu1 %v1103_v6  ;;  %v1109_v12 = vld [vmem:[#allocation7 + $0x98] sm:$0xff]   ;;  %v1112_v14 = vld [vmem:[#allocation7 + $0xa0] sm:$0xff]   ;;  %v1113_v17 = vld [vmem:[#allocation7 + $0x28] sm:$0xff]   ;;  %s1209_s26 = scalar_lea.vmem %s1669_s29, 1024  ;;  %s1324_s11 = smov [#allocation8]  }
  0x90   : > { %924 = vmatpush3.bf16.msra.mxu0 %v1101_v4  ;;  %v1115_v18 = vld [vmem:[#allocation7 + $0xa8] sm:$0xff]   ;;  %v1114_v20 = vld [vmem:[#allocation7 + $0x70] sm:$0xff]   ;;  %v1591_v23 = vld [vmem:[%s1570_s15] sm:$0xff]  ;;  %vm381_vm2 = vcmp.ge.s32.totalorder %v313_v51, 63  ;;  %p1210_p7 = scmp.ne.s32.totalorder %s1669_s29, %s1209_s26  ;;  %s1213_s14 = sshll.u32 %s1324_s11, 4  ;;  %s1214_s14 = int_to_ptr.vmem [resolvable:$false] %s1213_s14 }
  0x91   : > { %925 = vmatprep.subr.bf16.mxu0 %v1102_v5  ;;  %v1116_v21 = vld [vmem:[#allocation7 + $0x30] sm:$0xff]   ;;  %v296_v24 = vld [vmem:[%s1570_s15 + $0x8] sm:$0xff]  ;;  %v1595_v25 = vld [vmem:[%s1570_s15 + $0x38] sm:$0xff]  ;;  %v314_v27 = vrot.slane %v1591_v23, 7  ;;  %v354_v30 = vrot.slane %v1591_v23, 1  ;;  %s1215_s9 = scalar_lea.vmem %s1214_s14, 2048  ;;  %p1216_p4 = scmp.lt.s32.totalorder %s1669_s29, %s1214_s14 }
  0x92   : > { %976 = vmatpush3.bf16.msra.mxu1 %v1103_v6  ;;  %v1118_v22 = vld [vmem:[#allocation7 + $0xb0] sm:$0xff]   ;;  %v1117_v26 = vld [vmem:[#allocation7 + $0x78] sm:$0xff]   ;;  %v315_v28 = vrot.slane %v296_v24, 7  ;;  %v350_v29 = vpack.c.bf16 %v296_v24, %v1591_v23  ;;  %v355_v31 = vrot.slane %v296_v24, 1  ;;  %v321_v33 = vrot.slane %v1595_v25, 7  ;;  %v299_v38 = vld [vmem:[%s1570_s15 + $0x20] sm:$0xff]  ;;  %s1674_s5 = scalar_lea.hbm %s1765_s0, %s918_s4  ;;  %p1211_p1 = pnand %p1210_p7, %p1453_p11 }
  0x93   : > { %977 = vmatprep.subr.bf16.mxu1 %v1106_v9  ;;  %v303_v32 = vld [vmem:[%s1578_s10] sm:$0xff]  ;;  %v298_v37 = vld [vmem:[%s1570_s15 + $0x18] sm:$0xff]  ;;  %v358_v44 = vrot.slane %v299_v38, 1  ;;  %v300_v56 = vld [vmem:[%s1570_s15 + $0x28] sm:$0xff]  ;;  %v361_v59 = vrot.slane %v1595_v25, 1  ;;  %p1217_p9 = scmp.lt.s32.totalorder %s1215_s9, %s1209_s26 }
  0x94   : > { %926 = vmatpush3.bf16.msra.mxu0 %v1104_v7  ;;  %v297_v34 = vld [vmem:[%s1570_s15 + $0x10] sm:$0xff]  ;;  %625 = vmatprep.mubr.bf16.mxu0 %v350_v29  ;;  %v329_v35 = vsel %vm322_vm0, %v314_v27, %v315_v28  ;;  %v1119_v39 = vld [vmem:[#allocation7 + $0x38] sm:$0xff]   ;;  %v330_v40 = vsel %vm322_vm0, %v321_v33, %v314_v27  ;;  %v369_v42 = vsel %vm362_vm1, %v354_v30, %v355_v31  ;;  %v357_v43 = vrot.slane %v298_v37, 1  ;;  %v890_v24 = vld [vmem:[%s1733_s3] ss:$0 sm:$0xff]  ;;  %p1212_p2 = pneg %p1211_p1 }
  0x95   : > { %927 = vmatprep.subr.bf16.mxu0 %v1105_v8  ;;  %v356_v36 = vrot.slane %v297_v34, 1  ;;  %v1120_v41 = vld [vmem:[#allocation7 + $0xb8] sm:$0xff]   ;;  %v338_v45 = vsel %vm322_vm0, %v303_v32, %v330_v40  ;;  %v316_v48 = vrot.slane %v297_v34, 7  ;;  %v301_v49 = vld [vmem:[%s1570_s15 + $0x30] sm:$0xff]  ;;  %v317_v55 = vrot.slane %v298_v37, 7  ;;  %p1218_p6 = por %p1217_p9, %p1216_p4 }
  0x96   : > { %978 = vmatpush3.bf16.msra.mxu1 %v1106_v9  ;;  %v304_v50 = vld [vmem:[%s1578_s10 + $0x8] sm:$0xff]  ;;  %v346_v52 = vpack.c.bf16 %v329_v35, %v338_v45  ;;  %v366_v53 = vsel %vm362_vm1, %v357_v43, %v358_v44  ;;  %v351_v57 = vpack.c.bf16 %v298_v37, %v297_v34  ;;  %v359_v58 = vrot.slane %v300_v56, 1 }
  0x97   : > { %979 = vmatprep.subr.bf16.mxu1 %v1109_v12  ;;  %v368_v46 = vsel %vm362_vm1, %v355_v31, %v356_v36  ;;  %v367_v54 = vsel %vm362_vm1, %v356_v36, %v357_v43  ;;  %v360_v60 = vrot.slane %v301_v49, 1  ;;  %v371_v61 = vrot.slane %v304_v50, 1  ;;  %p1219_p10 = pnand %p1218_p6, %p1212_p2 }
  0x98   : > { %928 = vmatpush3.bf16.msra.mxu0 %v1107_v10  ;;  %v390_v47 = vpack.c.bf16 %v368_v46, %v369_v42  ;;  %v391_v62 = vpack.c.bf16 %v366_v53, %v367_v54  ;;  %v365_v63 = vsel %vm362_vm1, %v358_v44, %v359_v58  ;;  %v327_v0 = vsel %vm322_vm0, %v316_v48, %v317_v55 }
  0x99   : > { %929 = vmatprep.subr.bf16.mxu0 %v1108_v11  ;;  %v364_v1 = vsel %vm362_vm1, %v359_v58, %v360_v60  ;;  %v328_v2 = vsel %vm322_vm0, %v315_v28, %v316_v48  ;;  %v370_v4 = vsel %vm362_vm1, %v361_v59, %v354_v30  ;;  %v372_v5 = vsel %vm362_vm1, 0.0, %v371_v61 }
  0x9a   : > { %980 = vmatpush3.bf16.msra.mxu1 %v1109_v12  ;;  %989 = vmatprep.mubr.bf16.mxu1 %v390_v47  ;;  %v392_v3 = vpack.c.bf16 %v364_v1, %v365_v63  ;;  %v347_v6 = vpack.c.bf16 %v327_v0, %v328_v2  ;;  %v363_v7 = vsel %vm362_vm1, %v360_v60, %v361_v59  ;;  %v319_v9 = vrot.slane %v300_v56, 7 }
  0x9b   : > { %981 = vmatprep.subr.bf16.mxu1 %v1112_v14  ;;  %v389_v8 = vsel %vm381_vm2, %v372_v5, %v370_v4  ;;  %v352_v10 = vpack.c.bf16 %v300_v56, %v299_v38  ;;  %v318_v11 = vrot.slane %v299_v38, 7 }
  0x9c   : > { %930 = vmatpush3.bf16.msra.mxu0 %v1110_v13  ;;  %v393_v12 = vpack.c.bf16 %v389_v8, %v363_v7 }
  0x9d   : > { %931 = vmatprep.subr.bf16.mxu0 %v1111_v16  ;;  %v325_v13 = vsel %vm322_vm0, %v318_v11, %v319_v9  ;;  %v353_v16 = vpack.c.bf16 %v1595_v25, %v301_v49 }
  0x9e   : > { %982 = vmatpush3.bf16.msra.mxu1 %v1112_v14  ;;  %v326_v14 = vsel %vm322_vm0, %v317_v55, %v318_v11 }
  0x9f   : > { %983 = vmatprep.subr.bf16.mxu1 %v1115_v18  ;;  %v348_v15 = vpack.c.bf16 %v325_v13, %v326_v14 }
  0xa0   : > { %932 = vmatpush3.bf16.msra.mxu0 %v1113_v17  ;;  %v320_v17 = vrot.slane %v301_v49, 7 }
  0xa1   : > { %933 = vmatprep.subr.bf16.mxu0 %v1114_v20 }
  0xa2   : > { %984 = vmatpush3.bf16.msra.mxu1 %v1115_v18  ;;  %v323_v18 = vsel %vm322_vm0, %v320_v17, %v321_v33  ;;  %v324_v20 = vsel %vm322_vm0, %v319_v9, %v320_v17 }
  0xa3   : > { %985 = vmatprep.subr.bf16.mxu1 %v1118_v22 }
  0xa4   : > { %934 = vmatpush3.bf16.msra.mxu0 %v1116_v21  ;;  %v349_v21 = vpack.c.bf16 %v323_v18, %v324_v20 }
  0xa5   : > { %935 = vmatprep.subr.bf16.mxu0 %v1117_v26 }
  0xa6   : > { %986 = vmatpush3.bf16.msra.mxu1 %v1118_v22 }
  0xa7   : > { %987 = vmatprep.subr.bf16.mxu1 %v1120_v41 }
  0xa8   : > { %936 = vmatpush3.bf16.msra.mxu0 %v1119_v39 }
  0xaa   : > { %988 = vmatpush3.bf16.msra.mxu1 %v1120_v41 }
  0xab   : > { %626 = vmatmul.mubr.bf16.vlgmr.msra.gmra.mrb[0].mxu0 %v346_v52 }
  0xac   : > { %633 = vmatprep.mubr.bf16.mxu0 %v351_v57 }
  0xad   : > { %990 = vmatmul.mubr.bf16.vlgmr.msra.gmra.mrb[0].mxu1 %v391_v62 }
  0xae   : > { %993 = vmatprep.mubr.bf16.mxu1 %v392_v3 }
  0xb3   : > { %634 = vmatmul.mubr.bf16.gmra.mrb[4].mxu0 %v347_v6 }
  0xb4   : > { %641 = vmatprep.mubr.bf16.mxu0 %v352_v10 }
  0xb5   : > { %994 = vmatmul.mubr.bf16.gmra.mrb[4].mxu1 %v393_v12 }
  0xbb   : > { %642 = vmatmul.mubr.bf16.gmra.mrb[8].mxu0 %v348_v15 }
  0xbc   : > { %649 = vmatprep.mubr.bf16.mxu0 %v353_v16 }
  0xc3   : > { %650 = vmatmul.mubr.bf16.gmra.mrb[12].mxu0 %v349_v21 }
 0x17e   : > { %v937_v22 = vpop.f32.mrb[0].mxu0 }
 0x17f   : > { %v938_v23 = vpop.f32.mrb[1].mxu0 }
 0x180   : > { %v939_v26 = vadd.f32 %v938_v23, %v937_v22  ;;  %v940_v27 = vpop.f32.mrb[2].mxu0  ;;  %v991_v29 = vpop.f32.mrb[0].mxu1 }
 0x181   : > { %v941_v28 = vpop.f32.mrb[3].mxu0  ;;  %v692_v31 = vpop.f32.mrb[1].mxu1 }
 0x182   : > { %v942_v25 = vadd.f32 %v941_v28, %v940_v27  ;;  %v628_v30 = vadd.f32 %v939_v26, %v890_v24  ;;  %v992_v32 = vpop.f32.mrb[2].mxu1 }
 0x183   : > { %v695_v34 = vpop.f32.mrb[3].mxu1 }
 0x184   : > { %v693_v33 = vadd.f32 %v692_v31, %v628_v30  ;;  %v631_v19 = vadd.f32 %v942_v25, %v890_v24 }
 0x186   : > { %723 = vst [vmem:[%s1658_s12] sm:$0xff] %v693_v33  ;;  %v696_v35 = vadd.f32 %v695_v34, %v631_v19  ;;  %v943_v36 = vpop.f32.mrb[4].mxu0 }
 0x187   : > { %v944_v37 = vpop.f32.mrb[5].mxu0 }
 0x188   : > { %724 = vst [vmem:[%s1658_s12 + $0x8] sm:$0xff] %v696_v35  ;;  %v945_v38 = vadd.f32 %v944_v37, %v943_v36  ;;  %v946_v39 = vpop.f32.mrb[6].mxu0  ;;  %v995_v41 = vpop.f32.mrb[4].mxu1 }
 0x189   : > { %v947_v40 = vpop.f32.mrb[7].mxu0  ;;  %v708_v44 = vpop.f32.mrb[5].mxu1 }
 0x18a   : > { %v636_v42 = vadd.f32 %v945_v38, %v890_v24  ;;  %v948_v43 = vadd.f32 %v947_v40, %v946_v39  ;;  %v996_v45 = vpop.f32.mrb[6].mxu1 }
 0x18b   : > { %v711_v48 = vpop.f32.mrb[7].mxu1 }
 0x18c   : > { %v701_v46 = vadd.f32 %v991_v29, %v636_v42  ;;  %v639_v47 = vadd.f32 %v948_v43, %v890_v24 }
 0x18e   : > { %725 = vst [vmem:[%s1658_s12 + $0x10] sm:$0xff] %v701_v46  ;;  %v704_v49 = vadd.f32 %v992_v32, %v639_v47  ;;  %v949_v50 = vpop.f32.mrb[8].mxu0 }
 0x18f   : > { %v950_v51 = vpop.f32.mrb[9].mxu0 }
 0x190   : > { %726 = vst [vmem:[%s1658_s12 + $0x18] sm:$0xff] %v704_v49  ;;  %v951_v52 = vadd.f32 %v950_v51, %v949_v50  ;;  %v952_v53 = vpop.f32.mrb[10].mxu0 }
 0x191   : > { %v953_v54 = vpop.f32.mrb[11].mxu0 }
 0x192   : > { %v954_v55 = vadd.f32 %v953_v54, %v952_v53  ;;  %v644_v56 = vadd.f32 %v951_v52, %v890_v24 }
 0x194   : > { %v709_v57 = vadd.f32 %v708_v44, %v644_v56  ;;  %v647_v58 = vadd.f32 %v954_v55, %v890_v24 }
 0x196   : > { %727 = vst [vmem:[%s1658_s12 + $0x20] sm:$0xff] %v709_v57  ;;  %v712_v59 = vadd.f32 %v711_v48, %v647_v58  ;;  %v955_v60 = vpop.f32.mrb[12].mxu0 }
 0x197   : > { %v956_v61 = vpop.f32.mrb[13].mxu0 }
 0x198   : > { %728 = vst [vmem:[%s1658_s12 + $0x28] sm:$0xff] %v712_v59  ;;  %v957_v62 = vadd.f32 %v956_v61, %v955_v60  ;;  %v958_v63 = vpop.f32.mrb[14].mxu0 }
 0x199   : > { %v959_v0 = vpop.f32.mrb[15].mxu0 }
 0x19a   : > { %v652_v1 = vadd.f32 %v957_v62, %v890_v24  ;;  %v960_v2 = vadd.f32 %v959_v0, %v958_v63 }
 0x19c   : > { %v717_v3 = vadd.f32 %v995_v41, %v652_v1  ;;  %v655_v4 = vadd.f32 %v960_v2, %v890_v24 }
 0x19e   : > { %729 = vst [vmem:[%s1658_s12 + $0x30] sm:$0xff] %v717_v3  ;;  %v720_v5 = vadd.f32 %v996_v45, %v655_v4 }
 0x1a0   : > { %730 = vst [vmem:[%s1658_s12 + $0x38] sm:$0xff] %v720_v5 }
 0x1a1   : > { %1222 = shalt.err (!%p1219_p10)
}
 0x1a2   : > { %s1223_s15 = scalar_lea.hbm %s1674_s5, 1024  ;;  %s1227_s24 = scalar_lea.hbm %s1765_s0, 8192 }
 0x1a3   : > { %p1224_p12 = scmp.ne.s32.totalorder %s1674_s5, %s1223_s15  ;;  %p1228_p8 = scmp.lt.u32.totalorder %s1674_s5, %s1765_s0 }
 0x1a4   : > { %p1229_p0 = scmp.lt.u32.totalorder %s1227_s24, %s1223_s15  ;;  %p1231_p7 = scmp.lt.u32.totalorder %s1223_s15, %s1674_s5 }
 0x1a5   : > { %p1225_p13 = pnand %p1224_p12, %p1453_p11 }
 0x1a6   : > { %p1230_p3 = por %p1229_p0, %p1228_p8 }
 0x1a7   : > { %p1226_p5 = pneg %p1225_p13 }
 0x1a8   : > { %p1232_p1 = por %p1231_p7, %p1230_p3 }
 0x1aa   : > { %p1233_p2 = pnand %p1232_p1, %p1226_p5 }
 0x1ac   : > { %1236 = shalt.err (!%p1233_p2)
}
 0x1ad   : > { %s1325_s25 = smov 128   ;;  %s1326_s12 = smov 8  }
 0x1ae   : > { %1005 = dma.vmem_to_hbm [thread:$0]  (%p1453_p11), %s1669_s29, 1024, %s1674_s5, %s732_s6, %s1325_s25, %s1325_s25, %s1326_s12  }
 0x1af PF: > { %s1766_s28 = sld [smem:[#allocation13_spill]]  ;;  %s1767_s8 = sld [smem:[#allocation14_spill]] }
 0x1b0   : > { %p1025_p4 = scmp.ge.s32.totalorder %s1315_s22, 2 }
 0x1b5   : > { %s762_s7 = sand.u32 1, %s1766_s28   ;;  %p1768_p9 = scmp.ne.s32.totalorder %s1767_s8, 0 }
 0x1b6   : > { %s763_s4 = scalar_lea.sflag [#allocation4], %s762_s7 }
 0x1b7   : > { %p1019_p6 = pnand %p1025_p4, %p1768_p9 }
 0x1b9   : > { %1282 = dma.done.wait (!%p1019_p6), %s763_s4, 1024  }
 0x1ba   : > { %1284 = vsyncadd (!%p1019_p6), %s763_s4, 4294966272  ;;  %s23_s22 = sadd.s32 1, %s1315_s22   ;;  %s1769_s18 = sld [smem:[#allocation17_spill]] }
 0x1bb   : > { %p20_p10 = scmp.ge.s32.totalorder %s23_s22, 10   ;;  %s1770_s30 = sld [smem:[#allocation15_spill]] }
 0x1bc   : > { %s1771_s13 = sld [smem:[#allocation16_spill]]  ;;  %s1772_s15 = smov %s1291_s16 }
 0x1bd   : > { %s1773_s16 = smov %s1295_s17  ;;  %s1776_s19 = smov %s1311_s21 }
 0x1be   :  { %22 = sbr.rel (!%p20_p10) target bundleno = 13 (0xd), region = 98 }
 0x1c0   : > { %s1774_s17 = smov %s1769_s18  ;;  %s1775_s18 = smov %s1307_s20 }
 0x1c1   : > { %s1777_s20 = smov %s1770_s30 }
 0x1c2   : > { %s1778_s21 = smov %s1771_s13 }
 0x1c5   :  { %768 = vsyncpa [#allocation3], 1 }
 0x1c6   :  { %770 = vsyncpa [#allocation3 + $0x1], 1 }
 0x1c7   :  { %771 = vsyncpa [#allocation6], 1 }
 0x1c8   :  { %773 = vsyncpa [#allocation6 + $0x1], 1 }
 0x1c9   :  { %774 = vsyncpa [#allocation4], 1 }
 0x1ca   :  { %776 = vsyncpa [#allocation4 + $0x1], 1 }

</bundles_post_ra>
